<compile_context>
chip_gen: v7x
topology: tpu7x:2x2x1
jax: 0.10.0
libtpu: 0.0.40
codegen_flags: <defaults>
</compile_context>

<pallas_src>
import jax
import jax.numpy as jnp
from jax import lax
from jax.experimental import pallas as pl
from jax.experimental.pallas import tpu as pltpu

N_CHANNEL = 16
KSIZE = 3


def _round_up(x, m):
    return (x + m - 1) // m * m


def _pick_batch_block(n, h, w):
    """Batch elements per grid step: amortize per-step overhead on coarse levels while
    keeping the double-buffered x block to a few MiB on fine levels (and the in-kernel
    unroll bounded)."""
    cap = max(1, min(16, (1 << 16) // max(1, h * w)))  # ~<=4 MiB f32 x-block, <=16 unroll
    b = min(n, cap)
    while n % b:
        b -= 1
    return b


def _build_vt(linear_tensor_P, w, wo_pad):
    """Fused column-phase operator vt_cat (W, 3*WOp), float32.

    Block kh holds V_kh^T with V_kh^T[j, 2j + kw - 1] = P[kh, kw]; columns >= 2W-1
    (lane padding) are forced to zero so the padded output stays clean.
    Depends only on (P, W, WOp) -> callers can precompute/cache it per multigrid level
    and pass it via `vt=`.
    """
    p = jnp.asarray(linear_tensor_P, jnp.float32)
    wo = 2 * w - 1
    iw = jnp.arange(w, dtype=jnp.int32)[:, None]        # (W, 1)
    ow = jnp.arange(wo_pad, dtype=jnp.int32)[None, :]   # (1, WOp)
    valid = ow < wo
    blocks = []
    for kh in range(KSIZE):
        blk = sum(
            ((ow == 2 * iw + kw - 1) & valid).astype(jnp.float32) * p[kh, kw]
            for kw in range(KSIZE)
        )
        blocks.append(blk)
    return jnp.concatenate(blocks, axis=1)               # (W, 3*WOp)


def prolong_kernel(x_ref, vt_ref, o_ref):
    """x_ref : (B_blk, C, H, W)        VMEM  input block (B_blk batch elements)
       vt_ref: (W, 3*WOp)              VMEM  fused column operator (constant index -> fetched once)
       o_ref : (B_blk, 1, 2H, WOp)     VMEM  lane/sublane-padded output block
    """
    b_blk = x_ref.shape[0]
    h = x_ref.shape[2]
    wo_pad = o_ref.shape[3]

    vt = vt_ref[...]                                                   # hoisted: load once
    row_ids = lax.broadcasted_iota(jnp.int32, (h, wo_pad), 0)
    zero_row = jnp.zeros((1, wo_pad), jnp.float32)

    for b in range(b_blk):  # small static unroll (<=16)
        # Channel reduction: all 16 channels share the same stencil -> one plane.
        s = jnp.sum(x_ref[b].astype(jnp.float32), axis=0)              # (H, W)

        # Single fused column pass on the MXU: c = s @ [V0^T | V1^T | V2^T].
        c = jnp.dot(s, vt, preferred_element_type=jnp.float32)         # (H, 3*WOp)
        c0 = c[:, :wo_pad]
        c1 = c[:, wo_pad:2 * wo_pad]
        c2 = c[:, 2 * wo_pad:]

        # Row polyphase (no U matmul):
        #   out[2m]   = c1[m]
        #   out[2m+1] = c0[m+1] + c2[m]   (m = 0..H-2; row 2H-1 is padding -> zero)
        even = c1                                                       # (H, WOp)
        c0_up = jnp.concatenate([c0[1:, :], zero_row], axis=0)          # c0 shifted up by 1 row
        odd = jnp.where(row_ids < h - 1, c0_up + c2, 0.0)               # (H, WOp)

        # Interleave rows into final layout: (H, 2, WOp) -> (2H, WOp).
        inter = jnp.stack([even, odd], axis=1).reshape(2 * h, wo_pad)

        # Lane-dense, sublane-dense store of the whole padded plane.
        o_ref[b, 0, :, :] = inter.astype(o_ref.dtype)


def prolongation_forward(x, linear_tensor_P, *, vt=None, pad_output=False):
    """Equivalent of ProlongationNet(linear_tensor_P).forward(x).

    x               : (N, 16, H, W) float32
    linear_tensor_P : (3, 3) stencil (broadcast to all channels, as in the module)
    vt              : optional precomputed _build_vt(...) (cache per multigrid level)
    pad_output      : if True, return the lane/sublane-padded (N, 1, 2H, WOp) buffer
                      (zeros in padding) and skip the extra slicing pass.
    """
    n, c, h, w = x.shape
    assert c == N_CHANNEL, f"expected {N_CHANNEL} channels, got {c}"
    ho, wo = 2 * h - 1, 2 * w - 1
    wo_pad = _round_up(wo, 128)
    ho_pad = 2 * h

    if vt is None:
        vt = _build_vt(linear_tensor_P, w, wo_pad)

    b_blk = _pick_batch_block(n, h, w)
    grid = (n // b_blk,)

    # Realistic VMEM budget: only raise the limit when needed, and never ask for the
    # full physical VMEM (v7x has 64 MiB/TC; default scoped limit is 32 MiB).
    x_blk_bytes = b_blk * c * h * w * 4
    o_blk_bytes = b_blk * ho_pad * wo_pad * 4
    vt_bytes = w * 3 * wo_pad * 4
    need = 2 * (x_blk_bytes + o_blk_bytes + vt_bytes) + (2 << 20)  # double-buffered + slack
    params = {"dimension_semantics": ("parallel",)}
    if need > (32 << 20):
        try:
            cap = int(0.75 * pltpu.get_tpu_info().vmem_capacity_bytes)
        except Exception:
            cap = 48 << 20
        params["vmem_limit_bytes"] = int(min(need, cap))
    compiler_params = pltpu.CompilerParams(**params)

    out = pl.pallas_call(
        prolong_kernel,
        out_shape=jax.ShapeDtypeStruct((n, 1, ho_pad, wo_pad), x.dtype),
        grid=grid,
        in_specs=[
            pl.BlockSpec((b_blk, c, h, w), lambda i: (i, 0, 0, 0)),
            pl.BlockSpec((w, 3 * wo_pad), lambda i: (0, 0)),   # constant block -> fetched once
        ],
        out_specs=pl.BlockSpec((b_blk, 1, ho_pad, wo_pad), lambda i: (i, 0, 0, 0)),
        compiler_params=compiler_params,
    )(x, vt)

    if pad_output:
        return out
    return out[:, :, :ho, :wo]


def prolongation_reference(x, linear_tensor_P):
    """Pure-JAX reference: ConvTranspose2d == conv_general_dilated with lhs_dilation."""
    c = x.shape[1]
    w_ct = jnp.broadcast_to(jnp.asarray(linear_tensor_P, jnp.float32), (c, KSIZE, KSIZE))
    w_flip = w_ct[:, ::-1, ::-1]
    rhs = w_flip[None]  # (O=1, I=C, 3, 3)
    return jax.lax.conv_general_dilated(
        x, rhs,
        window_strides=(1, 1),
        padding=[(1, 1), (1, 1)],
        lhs_dilation=(2, 2),
        rhs_dilation=(1, 1),
        dimension_numbers=("NCHW", "OIHW", "NCHW"),
    )


if __name__ == "__main__":
    # Deterministic "linear_tensor_P": the standard bilinear prolongation stencil.
    P = jnp.array([[0.25, 0.5, 0.25],
                   [0.5,  1.0, 0.5],
                   [0.25, 0.5, 0.25]], dtype=jnp.float32)

    key = jax.random.PRNGKey(0)
    x = jax.random.normal(key, (2, N_CHANNEL, 16, 16), dtype=jnp.float32)

    out = prolongation_forward(x, P)
    out = jax.block_until_ready(out)

    ref = prolongation_reference(x, P)
    assert out.shape == (2, 1, 31, 31), out.shape
    assert bool(jnp.allclose(out, ref, atol=1e-4, rtol=1e-4)), "mismatch vs reference"

    print("KERNEL_OK")
</pallas_src>

<mosaic_0001>
module attributes {stable_mosaic.version = 11 : i64} {
  func.func @prolong_kernel(%arg0: i32, %arg1: memref<2x16x16x16xf32, #tpu.memory_space<vmem>>, %arg2: memref<16x384xf32, #tpu.memory_space<vmem>>, %arg3: memref<2x1x32x128xf32, #tpu.memory_space<vmem>>) attributes {dimension_semantics = [#tpu.dimension_semantics<parallel>], iteration_bounds = array<i64: 1>, scalar_prefetch = 0 : i64, scratch_operands = 0 : i64, tpu.core_type = #tpu.core_type<tc>, window_params = [{transform_indices = @transform_0, window_bounds = array<i64: 2, 16, 16, 16>}, {pipeline_mode = #tpu.pipeline_mode<synchronous>, transform_indices = @transform_1, window_bounds = array<i64: 16, 384>}, {transform_indices = @transform_2, window_bounds = array<i64: 2, 1, 32, 128>}]} {
    %c0 = arith.constant 0 : index
    %c0_0 = arith.constant 0 : index
    %0 = vector.load %arg2[%c0, %c0_0] : memref<16x384xf32, #tpu.memory_space<vmem>>, vector<16x384xf32>
    %1 = tpu.iota {dimensions = array<i32: 0>} : vector<16x128xi32>
    %cst = arith.constant 0.000000e+00 : f32
    %2 = vector.broadcast %cst : f32 to vector<1x128xf32>
    %c0_1 = arith.constant 0 : index
    %c0_2 = arith.constant 0 : index
    %c0_3 = arith.constant 0 : index
    %c0_4 = arith.constant 0 : index
    %3 = vector.load %arg1[%c0_1, %c0_2, %c0_3, %c0_4] : memref<2x16x16x16xf32, #tpu.memory_space<vmem>>, vector<1x16x16x16xf32>
    %4 = vector.shape_cast %3 : vector<1x16x16x16xf32> to vector<16x16x16xf32>
    %cst_5 = arith.constant dense<0.000000e+00> : vector<16x16xf32>
    %5 = vector.multi_reduction <add>, %4, %cst_5 [0] : vector<16x16x16xf32> to vector<16x16xf32>
    %cst_6 = arith.constant dense<0.000000e+00> : vector<16x384xf32>
    %6 = tpu.matmul %5, %0, %cst_6 {dimension_numbers = #tpu.dot_dimension_numbers<[1], [0], [0], [1], [0, 0, 1, 1], [], []>} : vector<16x16xf32>, vector<16x384xf32>, vector<16x384xf32> -> vector<16x384xf32>
    %7 = vector.extract_strided_slice %6 {offsets = [0, 0], sizes = [16, 128], strides = [1, 1]} : vector<16x384xf32> to vector<16x128xf32>
    %8 = vector.extract_strided_slice %6 {offsets = [0, 128], sizes = [16, 128], strides = [1, 1]} : vector<16x384xf32> to vector<16x128xf32>
    %9 = vector.extract_strided_slice %6 {offsets = [0, 256], sizes = [16, 128], strides = [1, 1]} : vector<16x384xf32> to vector<16x128xf32>
    %10 = vector.extract_strided_slice %7 {offsets = [1, 0], sizes = [15, 128], strides = [1, 1]} : vector<16x128xf32> to vector<15x128xf32>
    %11 = tpu.concatenate %10, %2 in 0 : vector<15x128xf32>, vector<1x128xf32> -> vector<16x128xf32>
    %c15_i32 = arith.constant 15 : i32
    %12 = vector.broadcast %c15_i32 : i32 to vector<16x128xi32>
    %13 = arith.cmpi slt, %1, %12 : vector<16x128xi32>
    %14 = arith.addf %11, %9 : vector<16x128xf32>
    %cst_7 = arith.constant 0.000000e+00 : f32
    %15 = vector.broadcast %cst_7 : f32 to vector<16x128xf32>
    %16 = arith.select %13, %14, %15 : vector<16x128xi1>, vector<16x128xf32>
    %17 = vector.shape_cast %8 : vector<16x128xf32> to vector<16x1x128xf32>
    %18 = vector.shape_cast %16 : vector<16x128xf32> to vector<16x1x128xf32>
    %19 = tpu.concatenate %17, %18 in 1 : vector<16x1x128xf32>, vector<16x1x128xf32> -> vector<16x2x128xf32>
    %20 = vector.shape_cast %19 : vector<16x2x128xf32> to vector<32x128xf32>
    %c0_8 = arith.constant 0 : index
    %c0_9 = arith.constant 0 : index
    %c0_10 = arith.constant 0 : index
    %c0_11 = arith.constant 0 : index
    %21 = vector.load %arg3[%c0_8, %c0_9, %c0_10, %c0_11] : memref<2x1x32x128xf32, #tpu.memory_space<vmem>>, vector<1x1x32x128xf32>
    %22 = vector.shape_cast %21 : vector<1x1x32x128xf32> to vector<32x128xf32>
    %23 = vector.shape_cast %20 : vector<32x128xf32> to vector<1x1x32x128xf32>
    tpu.vector_store %arg3[%c0_8, %c0_9, %c0_10, %c0_11], %23 {strides = array<i32>} : memref<2x1x32x128xf32, #tpu.memory_space<vmem>>, vector<1x1x32x128xf32>,
    %c1 = arith.constant 1 : index
    %c0_12 = arith.constant 0 : index
    %c0_13 = arith.constant 0 : index
    %c0_14 = arith.constant 0 : index
    %24 = vector.load %arg1[%c1, %c0_12, %c0_13, %c0_14] : memref<2x16x16x16xf32, #tpu.memory_space<vmem>>, vector<1x16x16x16xf32>
    %25 = vector.shape_cast %24 : vector<1x16x16x16xf32> to vector<16x16x16xf32>
    %cst_15 = arith.constant dense<0.000000e+00> : vector<16x16xf32>
    %26 = vector.multi_reduction <add>, %25, %cst_15 [0] : vector<16x16x16xf32> to vector<16x16xf32>
    %cst_16 = arith.constant dense<0.000000e+00> : vector<16x384xf32>
    %27 = tpu.matmul %26, %0, %cst_16 {dimension_numbers = #tpu.dot_dimension_numbers<[1], [0], [0], [1], [0, 0, 1, 1], [], []>} : vector<16x16xf32>, vector<16x384xf32>, vector<16x384xf32> -> vector<16x384xf32>
    %28 = vector.extract_strided_slice %27 {offsets = [0, 0], sizes = [16, 128], strides = [1, 1]} : vector<16x384xf32> to vector<16x128xf32>
    %29 = vector.extract_strided_slice %27 {offsets = [0, 128], sizes = [16, 128], strides = [1, 1]} : vector<16x384xf32> to vector<16x128xf32>
    %30 = vector.extract_strided_slice %27 {offsets = [0, 256], sizes = [16, 128], strides = [1, 1]} : vector<16x384xf32> to vector<16x128xf32>
    %31 = vector.extract_strided_slice %28 {offsets = [1, 0], sizes = [15, 128], strides = [1, 1]} : vector<16x128xf32> to vector<15x128xf32>
    %32 = tpu.concatenate %31, %2 in 0 : vector<15x128xf32>, vector<1x128xf32> -> vector<16x128xf32>
    %c15_i32_17 = arith.constant 15 : i32
    %33 = vector.broadcast %c15_i32_17 : i32 to vector<16x128xi32>
    %34 = arith.cmpi slt, %1, %33 : vector<16x128xi32>
    %35 = arith.addf %32, %30 : vector<16x128xf32>
    %cst_18 = arith.constant 0.000000e+00 : f32
    %36 = vector.broadcast %cst_18 : f32 to vector<16x128xf32>
    %37 = arith.select %34, %35, %36 : vector<16x128xi1>, vector<16x128xf32>
    %38 = vector.shape_cast %29 : vector<16x128xf32> to vector<16x1x128xf32>
    %39 = vector.shape_cast %37 : vector<16x128xf32> to vector<16x1x128xf32>
    %40 = tpu.concatenate %38, %39 in 1 : vector<16x1x128xf32>, vector<16x1x128xf32> -> vector<16x2x128xf32>
    %41 = vector.shape_cast %40 : vector<16x2x128xf32> to vector<32x128xf32>
    %c1_19 = arith.constant 1 : index
    %c0_20 = arith.constant 0 : index
    %c0_21 = arith.constant 0 : index
    %c0_22 = arith.constant 0 : index
    %42 = vector.load %arg3[%c1_19, %c0_20, %c0_21, %c0_22] : memref<2x1x32x128xf32, #tpu.memory_space<vmem>>, vector<1x1x32x128xf32>
    %43 = vector.shape_cast %42 : vector<1x1x32x128xf32> to vector<32x128xf32>
    %44 = vector.shape_cast %41 : vector<32x128xf32> to vector<1x1x32x128xf32>
    tpu.vector_store %arg3[%c1_19, %c0_20, %c0_21, %c0_22], %44 {strides = array<i32>} : memref<2x1x32x128xf32, #tpu.memory_space<vmem>>, vector<1x1x32x128xf32>,
    return
  }
  func.func @transform_0(%arg0: i32) -> (i32, i32, i32, i32) {
    %c0_i32 = arith.constant 0 : i32
    %c0_i32_0 = arith.constant 0 : i32
    %c0_i32_1 = arith.constant 0 : i32
    %c0_i32_2 = arith.constant 0 : i32
    return %arg0, %c0_i32, %c0_i32_0, %c0_i32_1 : i32, i32, i32, i32
  }
  func.func @transform_1(%arg0: i32) -> (i32, i32) {
    %c0_i32 = arith.constant 0 : i32
    %c0_i32_0 = arith.constant 0 : i32
    %c0_i32_1 = arith.constant 0 : i32
    return %c0_i32, %c0_i32_0 : i32, i32
  }
  func.func @transform_2(%arg0: i32) -> (i32, i32, i32, i32) {
    %c0_i32 = arith.constant 0 : i32
    %c0_i32_0 = arith.constant 0 : i32
    %c0_i32_1 = arith.constant 0 : i32
    %c0_i32_2 = arith.constant 0 : i32
    return %arg0, %c0_i32, %c0_i32_0, %c0_i32_1 : i32, i32, i32, i32
  }
}

</mosaic_0001>

<bundles_post_ra>
// kernel: tpu_custom_call.1
= control target key start
LH: loop header
LB: loop body
LE: loop exit
PB: predicated region body
PF: predicated region fallthrough
CT: control target
= control target key end

     0   :  { %7 = vsyncpa [#allocation3], 0  ;;  %s1999_s0 = inlined_call_operand.hbm [shape: f32[2,16,16,16], index: 0, kind: input, shape index: {}]   ;;  %s2000_s1 = inlined_call_operand.hbm [shape: f32[16,384], index: 1, kind: input, shape index: {}]   ;;  %s2001_s2 = inlined_call_operand.hbm [shape: f32[2,1,32,128], index: 2, kind: output, shape index: {}]  }
   0x1   :  { %8 = vsyncpa [#allocation6], 0 }
   0x2   :  { %9 = vsyncpa [#allocation4], 0  ;;  %s1538_s9 = smov [#allocation2]   ;;  %s1466_s13 = scalar_lea.hbm %s1999_s0, 8192 }
   0x3   :  { %s15_s10 = sshll.u32 %s1538_s9, 4  ;;  %p1467_p0 = scmp.ne.s32.totalorder %s1999_s0, %s1466_s13  ;;  %s16_s10 = int_to_ptr.vmem [resolvable:$true] %s15_s10 }
   0x4   :  { %p1470_p1 = scmp.lt.u32.totalorder %s1466_s13, %s1999_s0 }
   0x6   :  { %p1472_p2 = pnand %p1470_p1, %p1467_p0 }
   0x8   :  { %1475 = shalt.err (!%p1472_p2)
}
   0x9   :  { %s1476_s18 = scalar_lea.vmem %s16_s10, 8192  ;;  %p1481_p4 = scmp.lt.s32.totalorder %s16_s10, %s16_s10 }
   0xa   :  { %p1477_p3 = scmp.ne.s32.totalorder %s16_s10, %s1476_s18  ;;  %p1482_p5 = scmp.lt.s32.totalorder %s1476_s18, %s1476_s18 }
   0xc   :  { %p1483_p6 = por %p1482_p5, %p1481_p4 }
   0xe   :  { %p1484_p7 = pnand %p1483_p6, %p1477_p3 }
  0x10   :  { %1487 = shalt.err (!%p1484_p7)
}
  0x11   :  { %s1539_s19 = smov 128   ;;  %s1540_s20 = smov 8  }
  0x12   :  { %21 = dma.hbm_to_vmem [thread:$0]  %s1999_s0, 8192, %s16_s10, [#allocation3], %s1539_s19, %s1539_s19, %s1540_s20  }
  0x13   :  { %s1541_s23 = smov [#allocation5]   ;;  %s1488_s27 = scalar_lea.hbm %s2000_s1, 768 }
  0x14   :  { %s27_s24 = sshll.u32 %s1541_s23, 4  ;;  %p1489_p8 = scmp.ne.s32.totalorder %s2000_s1, %s1488_s27  ;;  %s28_s24 = int_to_ptr.vmem [resolvable:$true] %s27_s24 }
  0x15   :  { %p1492_p9 = scmp.lt.u32.totalorder %s1488_s27, %s2000_s1 }
  0x17   :  { %p1494_p10 = pnand %p1492_p9, %p1489_p8 }
  0x19   :  { %1497 = shalt.err (!%p1494_p10)
}
  0x1a   :  { %s1498_s4 = scalar_lea.vmem %s28_s24, 768  ;;  %p1503_p12 = scmp.lt.s32.totalorder %s28_s24, %s28_s24 }
  0x1b   :  { %p1499_p11 = scmp.ne.s32.totalorder %s28_s24, %s1498_s4  ;;  %p1504_p13 = scmp.lt.s32.totalorder %s1498_s4, %s1498_s4 }
  0x1d   :  { %p1505_p0 = por %p1504_p13, %p1503_p12 }
  0x1f   :  { %p1506_p1 = pnand %p1505_p0, %p1499_p11 }
  0x21   :  { %1509 = shalt.err (!%p1506_p1)
}
  0x22   :  { %s1542_s0 = smov 384   ;;  %s1543_s5 = smov 24  }
  0x23   :  { %33 = dma.hbm_to_vmem [thread:$0]  %s2000_s1, 768, %s28_s24, [#allocation6], %s1542_s0, %s1542_s0, %s1543_s5  }
  0x24   :  { %1532 = dma.done.wait [#allocation3], 8192  }
  0x25   :  { %1533 = vsyncadd [#allocation3], 4294959104 }
  0x26   :  { %1534 = dma.done.wait [#allocation6], 768  }
  0x27   :  { %1535 = vsyncadd [#allocation6], 4294966528  ;;  %v1544_v0 = vmov 0.0   ;;  %v41_v1 = vld [vmem:[#allocation5 + $0x8] sm:$0xff]  ;;  %v44_v2 = vld [vmem:[#allocation5 + $0x20] sm:$0xff]  ;;  %vm81_vm0 = vcmask 130048  }
  0x28   :  { %214 = vmatprep.mubr.f32.mxu0 %v1544_v0  ;;  %v42_v3 = vld [vmem:[#allocation5 + $0x10] sm:$0xff]  ;;  %v1440_v4 = vpack.c.bf16 %v44_v2, %v41_v1  ;;  %v45_v5 = vld [vmem:[#allocation5 + $0x28] sm:$0xff]  ;;  %v40_v6 = vld [vmem:[#allocation5] sm:$0xff]  ;;  %vm304_vm1 = vcmask 1046528   ;;  %vm613_vm2 = vcmask 1040384   ;;  %s1547_s1 = smov [#allocation7]  }
  0x29   :  { %v43_v7 = vld [vmem:[#allocation5 + $0x18] sm:$0xff]  ;;  %v1591_v8 = vpack.c.bf16 %v45_v5, %v42_v3  ;;  %v49_v10 = vld [vmem:[#allocation2] sm:$0xff]  ;;  %v51_v11 = vld [vmem:[#allocation2 + $0x10] sm:$0xff]  ;;  %s1397_s8 = sshll.u32 %s1547_s1, 4  ;;  %s1398_s8 = int_to_ptr.vmem [resolvable:$true] %s1397_s8 }
  0x2a   :  { %v1593_v9 = vpack.c.bf16 %v43_v7, %v40_v6  ;;  %v53_v12 = vld [vmem:[#allocation2 + $0x20] sm:$0xff]  ;;  %1441 = vmatprep.subr.bf16.mxu0 %v1440_v4  ;;  %v55_v13 = vld [vmem:[#allocation2 + $0x30] sm:$0xff]  ;;  %v82_v14 = vsel %vm81_vm0, %v49_v10, 0.0  ;;  %v83_v15 = vsel %vm81_vm0, %v51_v11, 0.0  ;;  %v50_v23 = vld [vmem:[#allocation2 + $0x8] sm:$0xff]  ;;  %s1510_s9 = scalar_lea.vmem %s1398_s8, 1024  ;;  %p1515_p3 = scmp.lt.s32.totalorder %s1398_s8, %s1398_s8 }
  0x2b   :  { %v85_v16 = vsel %vm81_vm0, %v53_v12, 0.0  ;;  %1445 = vmatprep.subr.bf16.mxu1 %v1591_v8  ;;  %v57_v17 = vld [vmem:[#allocation2 + $0x40] sm:$0xff]  ;;  %v84_v18 = vadd.f32 %v83_v15, %v82_v14  ;;  %v87_v19 = vsel %vm81_vm0, %v55_v13, 0.0  ;;  %v59_v20 = vld [vmem:[#allocation2 + $0x50] sm:$0xff]  ;;  %v52_v24 = vld [vmem:[#allocation2 + $0x18] sm:$0xff]  ;;  %v113_v29 = vsel %vm81_vm0, %v50_v23, 0.0  ;;  %p1511_p2 = scmp.ne.s32.totalorder %s1398_s8, %s1510_s9  ;;  %p1516_p4 = scmp.lt.s32.totalorder %s1510_s9, %s1510_s9 }
  0x2c   :  { %1443 = vmatpush1.bf16.msra.mxu0 %v1593_v9  ;;  %1447 = vmatpush3.bf16.msra.mxu1 %v1591_v8  ;;  %v89_v22 = vsel %vm81_vm0, %v57_v17, 0.0  ;;  %v61_v25 = vld [vmem:[#allocation2 + $0x60] sm:$0xff]  ;;  %v54_v27 = vld [vmem:[#allocation2 + $0x28] sm:$0xff]  ;;  %v56_v28 = vld [vmem:[#allocation2 + $0x38] sm:$0xff]  ;;  %v114_v30 = vsel %vm81_vm0, %v52_v24, 0.0  ;;  %v91_v31 = vsel %vm81_vm0, %v59_v20, 0.0 }
  0x2d   :  { %1453 = vmatprep.subr.bf16.mxu0 %v1591_v8  ;;  %v86_v21 = vadd.f32 %v85_v16, %v84_v18  ;;  %1449 = vmatprep.subr.bf16.mxu1 %v1440_v4  ;;  %v58_v32 = vld [vmem:[#allocation2 + $0x48] sm:$0xff]  ;;  %v115_v33 = vadd.f32 %v114_v30, %v113_v29  ;;  %v116_v34 = vsel %vm81_vm0, %v54_v27, 0.0  ;;  %v63_v35 = vld [vmem:[#allocation2 + $0x70] sm:$0xff]  ;;  %v118_v37 = vsel %vm81_vm0, %v56_v28, 0.0  ;;  %v60_v39 = vld [vmem:[#allocation2 + $0x58] sm:$0xff]  ;;  %p1517_p5 = por %p1516_p4, %p1515_p3 }
  0x2e   :  { %v93_v38 = vsel %vm81_vm0, %v61_v25, 0.0  ;;  %v65_v41 = vld [vmem:[#allocation2 + $0x80] sm:$0xff]  ;;  %v62_v43 = vld [vmem:[#allocation2 + $0x68] sm:$0xff]  ;;  %v120_v44 = vsel %vm81_vm0, %v58_v32, 0.0  ;;  %v95_v46 = vsel %vm81_vm0, %v63_v35, 0.0  ;;  %v725_v48 = vld [vmem:[#allocation2 + $0x110] sm:$0xff] }
  0x2f   :  { %v88_v26 = vadd.f32 %v87_v19, %v86_v21  ;;  %v117_v40 = vadd.f32 %v116_v34, %v115_v33  ;;  %v723_v45 = vld [vmem:[#allocation2 + $0x100] sm:$0xff]  ;;  %v729_v50 = vld [vmem:[#allocation2 + $0x130] sm:$0xff]  ;;  %v122_v54 = vsel %vm81_vm0, %v60_v39, 0.0  ;;  %v756_v55 = vsel %vm81_vm0, %v725_v48, 0.0  ;;  %v64_v59 = vld [vmem:[#allocation2 + $0x78] sm:$0xff]  ;;  %p1518_p6 = pnand %p1517_p5, %p1511_p2 }
  0x30   :  { %v727_v49 = vld [vmem:[#allocation2 + $0x120] sm:$0xff]  ;;  %v755_v51 = vsel %vm81_vm0, %v723_v45, 0.0  ;;  %v67_v52 = vld [vmem:[#allocation2 + $0x90] sm:$0xff]  ;;  %v97_v58 = vsel %vm81_vm0, %v65_v41, 0.0  ;;  %v66_v1 = vld [vmem:[#allocation2 + $0x88] sm:$0xff]  ;;  %v124_v2 = vsel %vm81_vm0, %v62_v43, 0.0 }
  0x31   :  { %v90_v36 = vadd.f32 %v89_v22, %v88_v26  ;;  %v119_v47 = vadd.f32 %v118_v37, %v117_v40  ;;  %v758_v56 = vsel %vm81_vm0, %v727_v49, 0.0  ;;  %v69_v57 = vld [vmem:[#allocation2 + $0xa0] sm:$0xff]  ;;  %v757_v62 = vadd.f32 %v756_v55, %v755_v51  ;;  %v733_v3 = vld [vmem:[#allocation2 + $0x150] sm:$0xff]  ;;  %v724_v15 = vld [vmem:[#allocation2 + $0x108] sm:$0xff] }
  0x32   :  { %v731_v61 = vld [vmem:[#allocation2 + $0x140] sm:$0xff]  ;;  %v760_v4 = vsel %vm81_vm0, %v729_v50, 0.0  ;;  %v71_v5 = vld [vmem:[#allocation2 + $0xb0] sm:$0xff]  ;;  %v99_v6 = vsel %vm81_vm0, %v67_v52, 0.0  ;;  %v101_v12 = vsel %vm81_vm0, %v69_v57, 0.0  ;;  %v126_v13 = vsel %vm81_vm0, %v64_v59, 0.0 }
  0x33   :  { %v92_v42 = vadd.f32 %v91_v31, %v90_v36  ;;  %v121_v60 = vadd.f32 %v120_v44, %v119_v47  ;;  %v759_v10 = vadd.f32 %v758_v56, %v757_v62  ;;  %v762_v14 = vsel %vm81_vm0, %v731_v61, 0.0  ;;  %v726_v16 = vld [vmem:[#allocation2 + $0x118] sm:$0xff]  ;;  %v728_v17 = vld [vmem:[#allocation2 + $0x128] sm:$0xff]  ;;  %v735_v21 = vld [vmem:[#allocation2 + $0x160] sm:$0xff] }
  0x34   :  { %v68_v18 = vld [vmem:[#allocation2 + $0x98] sm:$0xff]  ;;  %v128_v20 = vsel %vm81_vm0, %v66_v1, 0.0  ;;  %v764_v23 = vsel %vm81_vm0, %v733_v3, 0.0  ;;  %v73_v25 = vld [vmem:[#allocation2 + $0xc0] sm:$0xff]  ;;  %v786_v27 = vsel %vm81_vm0, %v724_v15, 0.0  ;;  %v787_v28 = vsel %vm81_vm0, %v726_v16, 0.0 }
  0x35   :  { %v94_v53 = vadd.f32 %v93_v38, %v92_v42  ;;  %v123_v7 = vadd.f32 %v122_v54, %v121_v60  ;;  %v761_v22 = vadd.f32 %v760_v4, %v759_v10  ;;  %v730_v24 = vld [vmem:[#allocation2 + $0x138] sm:$0xff]  ;;  %v789_v29 = vsel %vm81_vm0, %v728_v17, 0.0  ;;  %v70_v31 = vld [vmem:[#allocation2 + $0xa8] sm:$0xff]  ;;  %v737_v33 = vld [vmem:[#allocation2 + $0x170] sm:$0xff] }
  0x36   :  { %v103_v30 = vsel %vm81_vm0, %v71_v5, 0.0  ;;  %v732_v35 = vld [vmem:[#allocation2 + $0x148] sm:$0xff]  ;;  %v788_v36 = vadd.f32 %v787_v28, %v786_v27  ;;  %v75_v37 = vld [vmem:[#allocation2 + $0xd0] sm:$0xff]  ;;  %v130_v39 = vsel %vm81_vm0, %v68_v18, 0.0  ;;  %v766_v40 = vsel %vm81_vm0, %v735_v21, 0.0  ;;  %v72_v43 = vld [vmem:[#allocation2 + $0xb8] sm:$0xff] }
  0x37   :  { %v96_v63 = vadd.f32 %v95_v46, %v94_v53  ;;  %v125_v19 = vadd.f32 %v124_v2, %v123_v7  ;;  %v763_v34 = vadd.f32 %v762_v14, %v761_v22  ;;  %v791_v41 = vsel %vm81_vm0, %v730_v24, 0.0  ;;  %v739_v45 = vld [vmem:[#allocation2 + $0x180] sm:$0xff]  ;;  %v734_v47 = vld [vmem:[#allocation2 + $0x158] sm:$0xff]  ;;  %v74_v55 = vld [vmem:[#allocation2 + $0xc8] sm:$0xff] }
  0x38   :  { %v105_v42 = vsel %vm81_vm0, %v73_v25, 0.0  ;;  %v790_v48 = vadd.f32 %v789_v29, %v788_v36  ;;  %v77_v49 = vld [vmem:[#allocation2 + $0xe0] sm:$0xff]  ;;  %v132_v51 = vsel %vm81_vm0, %v70_v31, 0.0  ;;  %v768_v52 = vsel %vm81_vm0, %v737_v33, 0.0  ;;  %v741_v57 = vld [vmem:[#allocation2 + $0x190] sm:$0xff]  ;;  %v736_v59 = vld [vmem:[#allocation2 + $0x168] sm:$0xff] }
  0x39   :  { %v98_v11 = vadd.f32 %v97_v58, %v96_v63  ;;  %v127_v32 = vadd.f32 %v126_v13, %v125_v19  ;;  %v765_v46 = vadd.f32 %v764_v23, %v763_v34  ;;  %v793_v53 = vsel %vm81_vm0, %v732_v35, 0.0  ;;  %v79_v61 = vld [vmem:[#allocation2 + $0xf0] sm:$0xff]  ;;  %v76_v4 = vld [vmem:[#allocation2 + $0xd8] sm:$0xff]  ;;  %v78_v17 = vld [vmem:[#allocation2 + $0xe8] sm:$0xff] }
  0x3a   :  { %v107_v54 = vsel %vm81_vm0, %v75_v37, 0.0  ;;  %v792_v60 = vadd.f32 %v791_v41, %v790_v48  ;;  %v134_v63 = vsel %vm81_vm0, %v72_v43, 0.0  ;;  %v770_v1 = vsel %vm81_vm0, %v739_v45, 0.0  ;;  %v738_v10 = vld [vmem:[#allocation2 + $0x178] sm:$0xff]  ;;  %v745_v19 = vld [vmem:[#allocation2 + $0x1b0] sm:$0xff]  ;;  %v740_v21 = vld [vmem:[#allocation2 + $0x188] sm:$0xff] }
  0x3b   :  { %v100_v26 = vadd.f32 %v99_v6, %v98_v11  ;;  %v129_v44 = vadd.f32 %v128_v20, %v127_v32  ;;  %v767_v58 = vadd.f32 %v766_v40, %v765_v46  ;;  %v795_v2 = vsel %vm81_vm0, %v734_v47, 0.0  ;;  %v743_v6 = vld [vmem:[#allocation2 + $0x1a0] sm:$0xff]  ;;  %v80_v27 = vld [vmem:[#allocation2 + $0xf8] sm:$0xff]  ;;  %v744_v40 = vld [vmem:[#allocation2 + $0x1a8] sm:$0xff] }
  0x3c   :  { %v109_v3 = vsel %vm81_vm0, %v77_v49, 0.0  ;;  %v794_v11 = vadd.f32 %v793_v53, %v792_v60  ;;  %v136_v13 = vsel %vm81_vm0, %v74_v55, 0.0  ;;  %v772_v14 = vsel %vm81_vm0, %v741_v57, 0.0  ;;  %v747_v29 = vld [vmem:[#allocation2 + $0x1c0] sm:$0xff]  ;;  %v742_v31 = vld [vmem:[#allocation2 + $0x198] sm:$0xff]  ;;  %v753_v53 = vld [vmem:[#allocation2 + $0x1f0] sm:$0xff] }
  0x3d   :  { %v102_v38 = vadd.f32 %v101_v12, %v100_v26  ;;  %v131_v56 = vadd.f32 %v130_v39, %v129_v44  ;;  %v769_v7 = vadd.f32 %v768_v52, %v767_v58  ;;  %v797_v15 = vsel %vm81_vm0, %v736_v59, 0.0  ;;  %v751_v46 = vld [vmem:[#allocation2 + $0x1e0] sm:$0xff]  ;;  %v746_v48 = vld [vmem:[#allocation2 + $0x1b8] sm:$0xff]  ;;  %v748_v55 = vld [vmem:[#allocation2 + $0x1c8] sm:$0xff] }
  0x3e   :  { %v111_v16 = vsel %vm81_vm0, %v79_v61, 0.0  ;;  %v796_v22 = vadd.f32 %v795_v2, %v794_v11  ;;  %v138_v24 = vsel %vm81_vm0, %v76_v4, 0.0  ;;  %v774_v25 = vsel %vm81_vm0, %v743_v6, 0.0  ;;  %v750_v59 = vld [vmem:[#allocation2 + $0x1d8] sm:$0xff] }
  0x3f   :  { %v104_v50 = vadd.f32 %v103_v30, %v102_v38  ;;  %v133_v5 = vadd.f32 %v132_v51, %v131_v56  ;;  %v771_v20 = vadd.f32 %v770_v1, %v769_v7  ;;  %v799_v26 = vsel %vm81_vm0, %v738_v10, 0.0  ;;  %v749_v38 = vld [vmem:[#allocation2 + $0x1d0] sm:$0xff]  ;;  %v752_v1 = vld [vmem:[#allocation2 + $0x1e8] sm:$0xff] }
  0x40   :  { %v798_v32 = vadd.f32 %v797_v15, %v796_v22  ;;  %v140_v34 = vsel %vm81_vm0, %v78_v17, 0.0  ;;  %v776_v35 = vsel %vm81_vm0, %v745_v19, 0.0  ;;  %v801_v36 = vsel %vm81_vm0, %v740_v21, 0.0 }
  0x41   :  { %v106_v62 = vadd.f32 %v105_v42, %v104_v50  ;;  %v135_v18 = vadd.f32 %v134_v63, %v133_v5  ;;  %v773_v30 = vadd.f32 %v772_v14, %v771_v20  ;;  %v142_v42 = vsel %vm81_vm0, %v80_v27, 0.0  ;;  %v754_v5 = vld [vmem:[#allocation2 + $0x1f8] sm:$0xff] }
  0x42   :  { %v800_v41 = vadd.f32 %v799_v26, %v798_v32  ;;  %v778_v43 = vsel %vm81_vm0, %v747_v29, 0.0  ;;  %v803_v44 = vsel %vm81_vm0, %v742_v31, 0.0  ;;  %v780_v50 = vsel %vm81_vm0, %v749_v38, 0.0 }
  0x43   :  { %v108_v12 = vadd.f32 %v107_v54, %v106_v62  ;;  %v137_v28 = vadd.f32 %v136_v13, %v135_v18  ;;  %v775_v39 = vadd.f32 %v774_v25, %v773_v30  ;;  %v805_v51 = vsel %vm81_vm0, %v744_v40, 0.0 }
  0x44   :  { %v802_v49 = vadd.f32 %v801_v36, %v800_v41  ;;  %v782_v57 = vsel %vm81_vm0, %v751_v46, 0.0  ;;  %v807_v58 = vsel %vm81_vm0, %v746_v48, 0.0  ;;  %v784_v61 = vsel %vm81_vm0, %v753_v53, 0.0 }
  0x45   :  { %v110_v23 = vadd.f32 %v109_v3, %v108_v12  ;;  %v139_v37 = vadd.f32 %v138_v24, %v137_v28  ;;  %v777_v47 = vadd.f32 %v776_v35, %v775_v39  ;;  %v809_v62 = vsel %vm81_vm0, %v748_v55, 0.0 }
  0x46   :  { %v804_v56 = vadd.f32 %v803_v44, %v802_v49  ;;  %v811_v3 = vsel %vm81_vm0, %v750_v59, 0.0  ;;  %v813_v7 = vsel %vm81_vm0, %v752_v1, 0.0  ;;  %v46_v13 = vlaneseq }
  0x47   :  { %v112_v33 = vadd.f32 %v111_v16, %v110_v23  ;;  %v141_v45 = vadd.f32 %v140_v34, %v139_v37  ;;  %v779_v54 = vadd.f32 %v778_v43, %v777_v47  ;;  %v1545_v14 = vmov 1966171168  }
  0x48   :  { %v806_v60 = vadd.f32 %v805_v51, %v804_v56  ;;  %v321_v15 = vunpack.c.l.s4 %v1545_v14  ;;  %v47_v16 = vshrl.u32 %v46_v13, 7  ;;  %v1546_v20 = vmov 1983009808  }
  0x49   :  { %1410 = vmatmul.mubr.msk.f32.vlgmr.msra.gmra.mrb[0].mxu0 %vm81_vm0, %v112_v33  ;;  %1430 = vmatprep.mubr.msk.f32.mxu1 %vm81_vm0, %v112_v33  ;;  %v143_v52 = vadd.f32 %v142_v42, %v141_v45  ;;  %v649_v21 = vunpack.c.l.s4 %v1546_v20 }
  0x4a   :  { %220 = vmatprep.mubr.f32.mxu0 %v1544_v0  ;;  %1455 = vmatpush3.bf16.msra.mxu0 %v1591_v8  ;;  %v781_v8 = vadd.f32 %v780_v50, %v779_v54  ;;  %v808_v2 = vadd.f32 %v807_v58, %v806_v60  ;;  %v322_v17 = vunpack.c.0.s8 %v321_v15  ;;  %v1689_v35 = vsub.s32 0, %v47_v16 }
  0x4b   :  { %1431 = vmatmul.mubr.msk.f32.vlgmr.msra.gmra.mrb[0].mxu1 %vm81_vm0, %v143_v52  ;;  %v650_v27 = vunpack.c.0.s8 %v649_v21  ;;  %v1692_v40 = vadd.s32 8, %v47_v16 }
  0x4c   :  { %1451 = vmatpush1.bf16.msra.mxu1 %v1593_v9  ;;  %887 = vmatprep.mubr.f32.mxu1 %v1544_v0  ;;  %v783_v63 = vadd.f32 %v782_v57, %v781_v8  ;;  %v810_v6 = vadd.f32 %v809_v62, %v808_v2  ;;  %v815_v9 = vsel %vm81_vm0, %v754_v5, 0.0  ;;  %v1676_v18 = vsub.s32 %v322_v17, %v47_v16 }
  0x4d   :  { %1411 = vmatmul.mubr.msk.f32.gmra.mrb[2].mxu0 %vm81_vm0, %v143_v52  ;;  %v1701_v44 = vsub.s32 %v650_v27, %v47_v16  ;;  %vm312_vm3 = vcmp.lt.s32.totalorder %v1692_v40, 15 }
  0x4e   :  { %v785_v4 = vadd.f32 %v784_v61, %v783_v63  ;;  %v812_v10 = vadd.f32 %v811_v3, %v810_v6 }
  0x50   :  { %1414 = vmatmul.mubr.msk.f32.vlgmr.msra.gmra.mrb[2].mxu1 %vm81_vm0, %v785_v4  ;;  %1437 = vmatprep.mubr.msk.f32.mxu0 %vm81_vm0, %v785_v4  ;;  %v814_v11 = vadd.f32 %v813_v7, %v812_v10 }
  0x51   :  { %893 = vmatprep.mubr.f32.mxu1 %v1544_v0 }
  0x52   :  { %v816_v12 = vadd.f32 %v815_v9, %v814_v11 }
  0x54   :  { %1415 = vmatmul.mubr.msk.f32.gmra.mrb[4].mxu1 %vm81_vm0, %v816_v12  ;;  %1438 = vmatmul.mubr.msk.f32.vlgmr.msra.gmra.mrb[4].mxu0 %vm81_vm0, %v816_v12 }
 0x11c   :  { %v216_v19 = vpop.f32.mrb[0].mxu0 }
 0x11d   :  { %v218_v22 = vpop.f32.mrb[1].mxu0  ;;  %v305_v29 = vrot.slane %v216_v19, 1 }
 0x11e   :  { %v319_v0 = vcombine.high %v218_v22, %v218_v22  ;;  %v326_v23 = vrot.slane %v218_v22, %v1676_v18  ;;  %v1432_v28 = vpop.f32.mrb[0].mxu1 }
 0x11f   :  { %v293_v31 = vpop.f32.mrb[1].mxu1 }
 0x120   :  { %v333_v24 = vrot.slane %v319_v0, %v1676_v18  ;;  %v334_v25 = vcombine.high %v326_v23, %v326_v23  ;;  %v1681_v26 = vrot.slane %v326_v23, %v1676_v18  ;;  %v222_v30 = vpop.f32.mrb[2].mxu0 }
 0x121   :  { %v224_v36 = vpop.f32.mrb[3].mxu0  ;;  %v306_v37 = vrot.slane %v222_v30, 1 }
 0x122   :  { %v335_v32 = vcombine.high %v333_v24, %v333_v24  ;;  %v1684_v33 = vrot.slane %v333_v24, %v1676_v18  ;;  %v1687_v34 = vrot.slane %v334_v25, %v1676_v18  ;;  %v368_v38 = vcombine.high %v224_v36, %v224_v36 }
 0x123   :  { %v375_v39 = vrot.slane %v224_v36, %v1676_v18  ;;  %v364_v42 = vcombine.high %v1681_v26, %v1681_v26  ;;  %v307_v45 = vsel %vm304_vm1, %v305_v29, %v306_v37  ;;  %v310_v46 = vsel %vm304_vm1, %v306_v37, 0.0  ;;  %v1715_v54 = vpop.f32.mrb[2].mxu1 }
 0x124   :  { %v1695_v41 = vrot.slane %v335_v32, %v1676_v18  ;;  %v365_v43 = vcombine.high %v1684_v33, %v1684_v33  ;;  %v382_v47 = vrot.slane %v368_v38, %v1676_v18  ;;  %v366_v49 = vcombine.high %v1687_v34, %v1687_v34  ;;  %v891_v60 = vpop.f32.mrb[3].mxu1 }
 0x125   :  { %v383_v48 = vcombine.high %v375_v39, %v375_v39  ;;  %v313_v50 = vadd.f32 %v307_v45, %v293_v31  ;;  %v1708_v51 = vadd.f32 %v1432_v28, %v310_v46  ;;  %v1711_v52 = vrot.slane %v375_v39, %v1676_v18 }
 0x126   :  { %v367_v53 = vcombine.high %v1695_v41, %v1695_v41  ;;  %v384_v55 = vcombine.high %v382_v47, %v382_v47  ;;  %v1718_v56 = vrot.slane %v382_v47, %v1676_v18  ;;  %v977_v59 = vrot.slane %v1715_v54, 1 }
 0x127   :  { %v1721_v57 = vrot.slane %v383_v48, %v1676_v18  ;;  %v435_v58 = vcombine.high %v313_v50, %v313_v50  ;;  %v442_v8 = vrot.slane %v313_v50, %v1676_v18  ;;  %v413_v61 = vcombine.high %v1711_v52, %v1711_v52  ;;  %v895_v21 = vpop.f32.mrb[4].mxu1  ;;  %v1439_v22 = vpop.f32.mrb[4].mxu0 }
 0x128   :  { %v989_v62 = vcombine.high %v891_v60, %v891_v60  ;;  %v996_v63 = vrot.slane %v891_v60, %v1676_v18  ;;  %v1729_v1 = vrot.slane %v384_v55, %v1676_v18  ;;  %v414_v2 = vcombine.high %v1718_v56, %v1718_v56  ;;  %v897_v27 = vpop.f32.mrb[5].mxu1  ;;  %v966_v28 = vpop.f32.mrb[5].mxu0 }
 0x129   :  { %v449_v3 = vrot.slane %v435_v58, %v1676_v18  ;;  %v450_v4 = vcombine.high %v442_v8, %v442_v8  ;;  %v458_v5 = vrot.slane %v442_v8, %v1676_v18  ;;  %v415_v6 = vcombine.high %v1721_v57, %v1721_v57 }
 0x12a   :  { %v1003_v7 = vrot.slane %v989_v62, %v1676_v18  ;;  %v1004_v10 = vcombine.high %v996_v63, %v996_v63  ;;  %v1740_v9 = vrot.slane %v996_v63, %v1676_v18  ;;  %v416_v11 = vcombine.high %v1729_v1, %v1729_v1 }
 0x12b   :  { %v451_v12 = vcombine.high %v449_v3, %v449_v3  ;;  %v465_v13 = vrot.slane %v449_v3, %v1676_v18  ;;  %v472_v14 = vrot.slane %v450_v4, %v1676_v18  ;;  %v480_v15 = vcombine.high %v458_v5, %v458_v5 }
 0x12c   :  { %v536_v16 = vrot.slane %v458_v5, %v1689_v35  ;;  %v1005_v17 = vcombine.high %v1003_v7, %v1003_v7  ;;  %v1748_v19 = vrot.slane %v1003_v7, %v1676_v18  ;;  %v1751_v20 = vrot.slane %v1004_v10, %v1676_v18 }
 0x12d   :  { %v479_v0 = vrot.slane %v451_v12, %v1676_v18  ;;  %v481_v23 = vcombine.high %v465_v13, %v465_v13  ;;  %v482_v24 = vcombine.high %v472_v14, %v472_v14  ;;  %v540_v25 = vrot.slane %v472_v14, %v1689_v35 }
 0x12e   :  { %v544_v29 = vrot.slane %v480_v15, %v1689_v35  ;;  %v552_v30 = vrot.slane %v465_v13, %v1689_v35  ;;  %v1759_v31 = vsel %vm613_vm2, %v1681_v26, %v536_v16  ;;  %v1762_v32 = vrot.slane %v1005_v17, %v1676_v18 }
 0x12f   :  { %v483_v36 = vcombine.high %v479_v0, %v479_v0  ;;  %v548_v37 = vrot.slane %v482_v24, %v1689_v35  ;;  %v556_v38 = vrot.slane %v479_v0, %v1689_v35  ;;  %v560_v39 = vrot.slane %v481_v23, %v1689_v35 }
 0x130   :  { %v1769_v45 = vsel %vm613_vm2, %v1687_v34, %v540_v25  ;;  %v1772_v46 = vsel %vm613_vm2, %v364_v42, %v544_v29  ;;  %v1776_v26 = vsel %vm613_vm2, %v1684_v33, %v552_v30  ;;  %v1034_v47 = vcombine.high %v1740_v9, %v1740_v9 }
 0x131   :  { %v564_v48 = vrot.slane %v483_v36, %v1689_v35  ;;  %v1782_v50 = vsel %vm613_vm2, %v366_v49, %v548_v37  ;;  %v1786_v55 = vsel %vm613_vm2, %v1695_v41, %v556_v38  ;;  %v1792_v34 = vsel %vm613_vm2, %v365_v43, %v560_v39 }
 0x132   :  { %v646_v42 = vcombine.low %v1759_v31, %v1769_v45  ;;  %v647_v58 = vcombine.low %v1772_v46, %v1782_v50  ;;  %v663_v49 = vcombine.low %v1776_v26, %v1786_v55  ;;  %v1035_v8 = vcombine.high %v1748_v19, %v1748_v19 }
 0x133   :  { %v1803_v41 = vsel %vm613_vm2, %v367_v53, %v564_v48  ;;  %v1036_v33 = vcombine.high %v1751_v20, %v1751_v20  ;;  %v1037_v43 = vcombine.high %v1762_v32, %v1762_v32  ;;  %v978_v60 = vrot.slane %v895_v21, 1 }
 0x134   :  { %v664_v62 = vcombine.low %v1792_v34, %v1803_v41  ;;  %v1038_v63 = vcombine.high %v897_v27, %v897_v27  ;;  %v1045_v3 = vrot.slane %v897_v27, %v1676_v18  ;;  %v316_v4 = vsel %vm312_vm3, %v1708_v51, 0.0 }
 0x135   :  { %v484_v5 = vcombine.high %v316_v4, %v316_v4  ;;  %v491_v53 = vrot.slane %v316_v4, %v1676_v18  ;;  %v982_v7 = vsel %vm304_vm1, %v978_v60, 0.0  ;;  %v979_v10 = vsel %vm304_vm1, %v977_v59, %v978_v60 }
 0x136   :  { %v1052_v12 = vrot.slane %v1038_v63, %v1676_v18  ;;  %v1053_v13 = vcombine.high %v1045_v3, %v1045_v3  ;;  %v1822_v14 = vrot.slane %v1045_v3, %v1676_v18  ;;  %v984_v15 = vadd.f32 %v1439_v22, %v982_v7 }
 0x137   :  { %v498_v16 = vrot.slane %v484_v5, %v1676_v18  ;;  %v499_v17 = vcombine.high %v491_v53, %v491_v53  ;;  %v507_v51 = vrot.slane %v491_v53, %v1676_v18  ;;  %v983_v21 = vadd.f32 %v979_v10, %v966_v28 }
 0x138   :  { %v1054_v0 = vcombine.high %v1052_v12, %v1052_v12  ;;  %v1827_v23 = vrot.slane %v1052_v12, %v1676_v18  ;;  %v1830_v54 = vrot.slane %v1053_v13, %v1676_v18  ;;  %v1083_v59 = vcombine.high %v1822_v14, %v1822_v14 }
 0x139   :  { %v500_v24 = vcombine.high %v498_v16, %v498_v16  ;;  %v514_v25 = vrot.slane %v498_v16, %v1676_v18  ;;  %v521_v22 = vrot.slane %v499_v17, %v1676_v18  ;;  %v529_v27 = vcombine.high %v507_v51, %v507_v51 }
 0x13a   :  { %v1837_v29 = vrot.slane %v1054_v0, %v1676_v18  ;;  %v1084_v28 = vcombine.high %v1827_v23, %v1827_v23  ;;  %v1085_v30 = vcombine.high %v1830_v54, %v1830_v54  ;;  %v568_v36 = vrot.slane %v507_v51, %v1689_v35 }
 0x13b   :  { %v528_v37 = vrot.slane %v500_v24, %v1676_v18  ;;  %v530_v38 = vcombine.high %v514_v25, %v514_v25  ;;  %v531_v39 = vcombine.high %v521_v22, %v521_v22  ;;  %v572_v48 = vrot.slane %v521_v22, %v1689_v35 }
 0x13c   :  { %v1086_v60 = vcombine.high %v1837_v29, %v1837_v29  ;;  %v576_v63 = vrot.slane %v529_v27, %v1689_v35  ;;  %v584_v3 = vrot.slane %v514_v25, %v1689_v35  ;;  %v622_v4 = vsel %vm613_vm2, %v1711_v52, %v568_v36 }
 0x13d   :  { %v532_v5 = vcombine.high %v528_v37, %v528_v37  ;;  %v580_v53 = vrot.slane %v531_v39, %v1689_v35  ;;  %v588_v7 = vrot.slane %v528_v37, %v1689_v35  ;;  %v592_v10 = vrot.slane %v530_v38, %v1689_v35 }
 0x13e   :  { %v623_v12 = vsel %vm613_vm2, %v1721_v57, %v572_v48  ;;  %v624_v13 = vsel %vm613_vm2, %v413_v61, %v576_v63  ;;  %v626_v16 = vsel %vm613_vm2, %v1718_v56, %v584_v3  ;;  %v986_v17 = vsel %vm312_vm3, %v984_v15, 0.0 }
 0x13f   :  { %v596_v51 = vrot.slane %v532_v5, %v1689_v35  ;;  %v625_v0 = vsel %vm613_vm2, %v415_v6, %v580_v53  ;;  %v627_v24 = vsel %vm613_vm2, %v1729_v1, %v588_v7  ;;  %v628_v52 = vsel %vm613_vm2, %v414_v2, %v592_v10 }
 0x140   :  { %v680_v61 = vcombine.low %v622_v4, %v623_v12  ;;  %v681_v25 = vcombine.low %v624_v13, %v625_v0  ;;  %v697_v22 = vcombine.low %v626_v16, %v627_v24  ;;  %v1154_v40 = vcombine.high %v986_v17, %v986_v17 }
 0x141   :  { %v629_v15 = vsel %vm613_vm2, %v416_v11, %v596_v51  ;;  %v1161_v57 = vrot.slane %v986_v17, %v1676_v18  ;;  %v1105_v6 = vcombine.high %v983_v21, %v983_v21  ;;  %v1112_v27 = vrot.slane %v983_v21, %v1676_v18 }
 0x142   :  { %v688_v36 = vrot.slane %v680_v61, %v1701_v44  ;;  %v695_v56 = vrot.slane %v681_v25, %v1701_v44  ;;  %v698_v37 = vcombine.low %v628_v52, %v629_v15  ;;  %v705_v2 = vrot.slane %v697_v22, %v1701_v44 }
 0x143   :  { %v1168_v38 = vrot.slane %v1154_v40, %v1676_v18  ;;  %v1169_v39 = vcombine.high %v1161_v57, %v1161_v57  ;;  %v1177_v48 = vrot.slane %v1161_v57, %v1676_v18  ;;  %v1119_v1 = vrot.slane %v1105_v6, %v1676_v18 }
 0x144   :  { %v696_v11 = vcombine.low %v688_v36, %v695_v56  ;;  %v712_v63 = vrot.slane %v698_v37, %v1701_v44  ;;  %v1120_v3 = vcombine.high %v1112_v27, %v1112_v27  ;;  %v1128_v21 = vrot.slane %v1112_v27, %v1676_v18 }
 0x145   :  { %v1170_v4 = vcombine.high %v1168_v38, %v1168_v38  ;;  %v1184_v5 = vrot.slane %v1168_v38, %v1676_v18  ;;  %v1191_v53 = vrot.slane %v1169_v39, %v1676_v18  ;;  %v1199_v7 = vcombine.high %v1177_v48, %v1177_v48 }
 0x146   :  { %v713_v10 = vcombine.low %v705_v2, %v712_v63  ;;  %720 = vst [vmem:[#allocation7 + $0x10] sm:$0xff] %v696_v11  ;;  %v1238_v12 = vrot.slane %v1177_v48, %v1689_v35  ;;  %v1121_v13 = vcombine.high %v1119_v1, %v1119_v1  ;;  %v1135_v16 = vrot.slane %v1119_v1, %v1676_v18 }
 0x147   :  { %v1198_v17 = vrot.slane %v1170_v4, %v1676_v18  ;;  %v1200_v51 = vcombine.high %v1184_v5, %v1184_v5  ;;  %v1201_v0 = vcombine.high %v1191_v53, %v1191_v53  ;;  %v1242_v24 = vrot.slane %v1191_v53, %v1689_v35 }
 0x148   :  { %721 = vst [vmem:[#allocation7 + $0x18] sm:$0xff] %v713_v10  ;;  %v1246_v52 = vrot.slane %v1199_v7, %v1689_v35  ;;  %v1254_v61 = vrot.slane %v1184_v5, %v1689_v35  ;;  %v1291_v25 = vsel %vm613_vm2, %v1822_v14, %v1238_v12  ;;  %v1142_v22 = vrot.slane %v1120_v3, %v1676_v18 }
 0x149   :  { %v1202_v40 = vcombine.high %v1198_v17, %v1198_v17  ;;  %v1250_v15 = vrot.slane %v1201_v0, %v1689_v35  ;;  %v1258_v57 = vrot.slane %v1198_v17, %v1689_v35  ;;  %v1262_v6 = vrot.slane %v1200_v51, %v1689_v35 }
 0x14a   :  { %v1292_v27 = vsel %vm613_vm2, %v1830_v54, %v1242_v24  ;;  %v1293_v36 = vsel %vm613_vm2, %v1083_v59, %v1246_v52  ;;  %v1295_v56 = vsel %vm613_vm2, %v1827_v23, %v1254_v61  ;;  %v1149_v37 = vrot.slane %v1121_v13, %v1676_v18 }
 0x14b   :  { %v1266_v2 = vrot.slane %v1202_v40, %v1689_v35  ;;  %v1294_v38 = vsel %vm613_vm2, %v1085_v30, %v1250_v15  ;;  %v1296_v39 = vsel %vm613_vm2, %v1837_v29, %v1258_v57  ;;  %v1297_v14 = vsel %vm613_vm2, %v1084_v28, %v1262_v6 }
 0x14c   :  { %v1349_v59 = vcombine.low %v1291_v25, %v1292_v27  ;;  %v1350_v48 = vcombine.low %v1293_v36, %v1294_v38  ;;  %v1366_v1 = vcombine.low %v1295_v56, %v1296_v39  ;;  %v1150_v11 = vcombine.high %v1128_v21, %v1128_v21 }
 0x14d   :  { %v1298_v18 = vsel %vm613_vm2, %v1086_v60, %v1266_v2  ;;  %v1151_v54 = vcombine.high %v1135_v16, %v1135_v16  ;;  %v1152_v63 = vcombine.high %v1142_v22, %v1142_v22  ;;  %v1153_v30 = vcombine.high %v1149_v37, %v1149_v37 }
 0x14e   :  { %v1357_v3 = vrot.slane %v1349_v59, %v1701_v44  ;;  %v1364_v4 = vrot.slane %v1350_v48, %v1701_v44  ;;  %v1367_v5 = vcombine.low %v1297_v14, %v1298_v18  ;;  %v1374_v23 = vrot.slane %v1366_v1, %v1701_v44 }
 0x14f   :  { %v1206_v28 = vrot.slane %v1128_v21, %v1689_v35  ;;  %v1210_v53 = vrot.slane %v1142_v22, %v1689_v35  ;;  %v1214_v7 = vrot.slane %v1150_v11, %v1689_v35  ;;  %v1218_v29 = vrot.slane %v1152_v63, %v1689_v35 }
 0x150   :  { %v1365_v10 = vcombine.low %v1357_v3, %v1364_v4  ;;  %v1381_v60 = vrot.slane %v1367_v5, %v1701_v44  ;;  %v1222_v12 = vrot.slane %v1135_v16, %v1689_v35  ;;  %v1226_v13 = vrot.slane %v1149_v37, %v1689_v35 }
 0x151   :  { %v1230_v17 = vrot.slane %v1151_v54, %v1689_v35  ;;  %v1234_v51 = vrot.slane %v1153_v30, %v1689_v35  ;;  %v1283_v21 = vsel %vm613_vm2, %v1740_v9, %v1206_v28  ;;  %v1284_v0 = vsel %vm613_vm2, %v1751_v20, %v1210_v53 }
 0x152   :  { %v1382_v24 = vcombine.low %v1374_v23, %v1381_v60  ;;  %1390 = vst [vmem:[#allocation7 + $0x30] sm:$0xff] %v1365_v10  ;;  %v1285_v52 = vsel %vm613_vm2, %v1034_v47, %v1214_v7  ;;  %v1286_v16 = vsel %vm613_vm2, %v1036_v33, %v1218_v29  ;;  %v1287_v35 = vsel %vm613_vm2, %v1748_v19, %v1222_v12 }
 0x153   :  { %v1288_v61 = vsel %vm613_vm2, %v1762_v32, %v1226_v13  ;;  %v1289_v25 = vsel %vm613_vm2, %v1035_v8, %v1230_v17  ;;  %v1290_v9 = vsel %vm613_vm2, %v1037_v43, %v1234_v51  ;;  %v1315_v47 = vcombine.low %v1283_v21, %v1284_v0 }
 0x154   :  { %1391 = vst [vmem:[#allocation7 + $0x38] sm:$0xff] %v1382_v24  ;;  %v1316_v20 = vcombine.low %v1285_v52, %v1286_v16  ;;  %v1332_v33 = vcombine.low %v1287_v35, %v1288_v61  ;;  %v1333_v22 = vcombine.low %v1289_v25, %v1290_v9  ;;  %v654_v40 = vrot.slane %v646_v42, %v1701_v44 }
 0x155   :  { %v661_v19 = vrot.slane %v647_v58, %v1701_v44  ;;  %v671_v32 = vrot.slane %v663_v49, %v1701_v44  ;;  %v678_v8 = vrot.slane %v664_v62, %v1701_v44  ;;  %v1323_v31 = vrot.slane %v1315_v47, %v1701_v44 }
 0x156   :  { %v1330_v45 = vrot.slane %v1316_v20, %v1701_v44  ;;  %v1340_v42 = vrot.slane %v1332_v33, %v1701_v44  ;;  %v1347_v46 = vrot.slane %v1333_v22, %v1701_v44 }
 0x157   :  { %v662_v50 = vcombine.low %v654_v40, %v661_v19  ;;  %v679_v58 = vcombine.low %v671_v32, %v678_v8 }
 0x158   :  { %v1331_v43 = vcombine.low %v1323_v31, %v1330_v45  ;;  %v1348_v26 = vcombine.low %v1340_v42, %v1347_v46 }
 0x159   :  { %718 = vst [vmem:[#allocation7] sm:$0xff] %v662_v50  ;;  %719 = vst [vmem:[#allocation7 + $0x8] sm:$0xff] %v679_v58 }
 0x15a   :  { %1388 = vst [vmem:[#allocation7 + $0x20] sm:$0xff] %v1331_v43  ;;  %1389 = vst [vmem:[#allocation7 + $0x28] sm:$0xff] %v1348_v26 }
 0x15b   :  { %1521 = shalt.err (!%p1518_p6)
}
 0x15c   :  { %s1522_s12 = scalar_lea.hbm %s2001_s2, 1024 }
 0x15d   :  { %p1523_p7 = scmp.ne.s32.totalorder %s2001_s2, %s1522_s12  ;;  %p1526_p8 = scmp.lt.u32.totalorder %s1522_s12, %s2001_s2 }
 0x15f   :  { %p1528_p9 = pnand %p1526_p8, %p1523_p7 }
 0x161   :  { %1531 = shalt.err (!%p1528_p9)
}
 0x162   :  { %1403 = dma.vmem_to_hbm [thread:$0]  %s1398_s8, 1024, %s2001_s2, [#allocation4], %s1539_s19, %s1539_s19, %s1540_s20  }
 0x163   :  { %1536 = dma.done.wait [#allocation4], 1024  }
 0x164   :  { %1537 = vsyncadd [#allocation4], 4294966272 }
 0x165   :  { %1407 = vsyncpa [#allocation3], 1 }
 0x166   :  { %1408 = vsyncpa [#allocation6], 1 }
 0x167   :  { %1409 = vsyncpa [#allocation4], 1 }

</bundles_post_ra>
